<compile_context>
chip_gen: v7x
topology: tpu7x:2x2x1
jax: 0.10.0
libtpu: 0.0.40
codegen_flags: <defaults>
</compile_context>

<pallas_src>
import jax
import jax.numpy as jnp
from jax.experimental import pallas as pl
from jax.experimental.pallas import tpu as pltpu


def _input_embed_kernel(patches_ref, w_ref, add_ref, o_ref):
    # patches_ref: (Bt, N+1, Kp) bf16 -- im2col patches, row 0 of each batch is zeros (cls slot)
    # w_ref:       (Kp, E)       bf16 -- conv weight reshaped, resident across grid steps
    # add_ref:     (1, N+1, E)   f32  -- row 0 = cls token, rows 1..N = conv bias + pos embedding
    # o_ref:       (Bt, N+1, E)       -- per-step output block
    acc = jnp.einsum(
        "bnk,ke->bne", patches_ref[...], w_ref[...],
        preferred_element_type=jnp.float32)
    # f32 epilogue add; single aligned full-block store, cast only here.
    o_ref[...] = (acc + add_ref[...]).astype(o_ref.dtype)


def _pick_block_b(batch, requested=None):
    if requested is not None:
        if batch % requested:
            raise ValueError(f"block_b={requested} must divide batch={batch}")
        return requested
    best = 1
    for d in range(1, batch + 1):
        # amortize per-step overhead, but keep >=2 grid steps for megacore sharding
        if batch % d == 0 and d <= 8 and (batch // d) >= 2:
            best = d
    return best


def input_embedding(x, conv_w, conv_b, cls_emb, pos_emb, *, block_b=None,
                    compute_dtype=jnp.bfloat16):
    """x: (B, C, H, W); conv_w: (E, C, P, P); conv_b: (E,);
    cls_emb: (1, 1, E); pos_emb: (1, N, E), N = (H//P)*(W//P).
    Returns (B, N+1, E) in x.dtype (matches the PyTorch module's forward)."""
    B, C, H, W = x.shape
    E, Cw, P, Pw = conv_w.shape
    assert C == Cw and P == Pw and H % P == 0 and W % P == 0
    Hp, Wp = H // P, W // P
    N = Hp * Wp
    K = C * P * P
    assert cls_emb.shape == (1, 1, E)
    assert pos_emb.shape == (1, N, E)

    Bt = _pick_block_b(B, block_b)
    Kp = ((K + 127) // 128) * 128   # lane-align the contraction dim (no-op when K % 128 == 0)
    S = N + 1                       # output sequence length (cls + patches)

    # im2col in the wrapper (layout plumbing): patch n = (n // Wp, n % Wp), feature order
    # (c, ph, pw) matching conv_w.reshape(E, K).  The bf16 cast halves this stream's HBM bytes.
    # TODO(synk): fold the im2col into the operand DMA (in-kernel rearrange / input fusion) to
    # eliminate the materialized round trip entirely.
    patches = (x.reshape(B, C, Hp, P, Wp, P)
                 .transpose(0, 2, 4, 1, 3, 5)
                 .reshape(B, N, K))
    # One leading zero "patch" row per batch (matmul row 0 -> 0, becomes the cls slot) and
    # zero-pad K up to Kp.
    patches = jnp.pad(patches, ((0, 0), (1, 0), (0, Kp - K))).astype(compute_dtype)

    w2d = jnp.pad(conv_w.reshape(E, K).T, ((0, Kp - K), (0, 0))).astype(compute_dtype)  # (Kp, E)

    # Fused additive epilogue table: row 0 = cls token, rows 1..N = conv bias + pos embedding.
    add_table = jnp.concatenate(
        [cls_emb[0].astype(jnp.float32),
         (conv_b[None, :] + pos_emb[0]).astype(jnp.float32)],
        axis=0)[None]                                                    # (1, S, E) f32

    out_dtype = x.dtype
    cd_bytes = jnp.dtype(compute_dtype).itemsize
    out_bytes = jnp.dtype(out_dtype).itemsize

    # VMEM budget from actual (double-buffered) block sizes, clamped to a v7x-safe 48 MiB.
    block_bytes = (Bt * S * Kp * cd_bytes        # patches block
                   + Kp * E * cd_bytes           # weight (resident)
                   + S * E * 4                   # additive table (resident, f32)
                   + Bt * S * E * out_bytes)     # output block
    vmem_limit = int(min(48 * 1024 * 1024, max(32 * 1024 * 1024, 4 * block_bytes)))

    flops = 2 * B * S * Kp * E + B * S * E
    bytes_accessed = int(patches.size * cd_bytes + w2d.size * cd_bytes
                         + add_table.size * 4 + B * S * E * out_bytes)

    return pl.pallas_call(
        _input_embed_kernel,
        out_shape=jax.ShapeDtypeStruct((B, S, E), out_dtype),
        grid_spec=pltpu.PrefetchScalarGridSpec(
            num_scalar_prefetch=0,
            grid=(B // Bt,),
            in_specs=[
                pl.BlockSpec((Bt, S, Kp), lambda b: (b, 0, 0)),   # per-step patch block
                pl.BlockSpec((Kp, E),     lambda b: (0, 0)),      # weight (resident)
                pl.BlockSpec((1, S, E),   lambda b: (0, 0, 0)),   # cls/bias/pos table (resident)
            ],
            out_specs=pl.BlockSpec((Bt, S, E), lambda b: (b, 0, 0)),
        ),
        compiler_params=pltpu.CompilerParams(
            dimension_semantics=("parallel",),
            vmem_limit_bytes=vmem_limit,
        ),
        cost_estimate=pl.CostEstimate(
            flops=flops, transcendentals=0, bytes_accessed=bytes_accessed),
    )(patches, w2d, add_table)


if __name__ == "__main__":
    # Small config consistent with the module: B=2, C=3, image=16, patch=8 -> N=4 patches.
    # E=256 (multiple of 128, fills the 256-wide MXU; the real module default is 768).
    B, C = 2, 3
    image_size, patch_size, E = 16, 8, 256
    Hp = Wp = image_size // patch_size
    N = Hp * Wp

    key = jax.random.PRNGKey(0)
    kx, kw, kb, kc, kp = jax.random.split(key, 5)
    x = jax.random.normal(kx, (B, C, image_size, image_size), dtype=jnp.float32)
    conv_w = jax.random.normal(kw, (E, C, patch_size, patch_size), dtype=jnp.float32) * 0.05
    conv_b = jax.random.normal(kb, (E,), dtype=jnp.float32)
    # PyTorch inits cls/pos to zeros; use non-zero values so the fused ops are observable.
    cls_emb = jax.random.normal(kc, (1, 1, E), dtype=jnp.float32)
    pos_emb = jax.random.normal(kp, (1, N, E), dtype=jnp.float32)

    out = input_embedding(x, conv_w, conv_b, cls_emb, pos_emb)
    jax.block_until_ready(out)

    # Pure-JAX reference: conv -> flatten/transpose -> +pos -> prepend cls (module semantics:
    # pos is added to the N patch rows only, cls is prepended afterwards).
    conv = jax.lax.conv_general_dilated(
        x, conv_w, window_strides=(patch_size, patch_size), padding="VALID",
        dimension_numbers=("NCHW", "OIHW", "NCHW"))
    body = conv.reshape(B, E, N).transpose(0, 2, 1) + conv_b[None, None, :] + pos_emb
    ref = jnp.concatenate([jnp.broadcast_to(cls_emb, (B, 1, E)), body], axis=1)

    assert out.shape == (B, N + 1, E)
    rel_err = float(jnp.max(jnp.abs(out - ref)) / (jnp.max(jnp.abs(ref)) + 1e-6))
    assert rel_err < 2e-2, f"mismatch vs reference: rel err {rel_err}"
    print("KERNEL_OK")
</pallas_src>

<mosaic_0001>
module attributes {stable_mosaic.version = 11 : i64} {
  func.func @_input_embed_kernel(%arg0: i32, %arg1: memref<1x5x256xbf16, #tpu.memory_space<vmem>>, %arg2: memref<256x256xbf16, #tpu.memory_space<vmem>>, %arg3: memref<1x5x256xf32, #tpu.memory_space<vmem>>, %arg4: memref<1x5x256xf32, #tpu.memory_space<vmem>>) attributes {dimension_semantics = [#tpu.dimension_semantics<parallel>], iteration_bounds = array<i64: 2>, scalar_prefetch = 0 : i64, scratch_operands = 0 : i64, tpu.core_type = #tpu.core_type<tc>, window_params = [{transform_indices = @transform_0, window_bounds = array<i64: 1, 5, 256>}, {pipeline_mode = #tpu.pipeline_mode<synchronous>, transform_indices = @transform_1, window_bounds = array<i64: 256, 256>}, {pipeline_mode = #tpu.pipeline_mode<synchronous>, transform_indices = @transform_2, window_bounds = array<i64: 1, 5, 256>}, {transform_indices = @transform_3, window_bounds = array<i64: 1, 5, 256>}]} {
    %c0 = arith.constant 0 : index
    %c0_0 = arith.constant 0 : index
    %c0_1 = arith.constant 0 : index
    %0 = vector.load %arg1[%c0, %c0_0, %c0_1] : memref<1x5x256xbf16, #tpu.memory_space<vmem>>, vector<1x5x256xbf16>
    %c0_2 = arith.constant 0 : index
    %c0_3 = arith.constant 0 : index
    %1 = vector.load %arg2[%c0_2, %c0_3] : memref<256x256xbf16, #tpu.memory_space<vmem>>, vector<256x256xbf16>
    "tpu.trace_start"() <{level = 10 : i32, message = "bnk,ke->bne"}> : () -> ()
    %cst = arith.constant dense<0.000000e+00> : vector<1x5x256xf32>
    %2 = tpu.matmul %0, %1, %cst {dimension_numbers = #tpu.dot_dimension_numbers<[2], [0], [0, 1], [1], [0, 0, 0, 1, 1, 1], [], []>} : vector<1x5x256xbf16>, vector<256x256xbf16>, vector<1x5x256xf32> -> vector<1x5x256xf32>
    "tpu.trace_stop"() : () -> ()
    %c0_4 = arith.constant 0 : index
    %c0_5 = arith.constant 0 : index
    %c0_6 = arith.constant 0 : index
    %3 = vector.load %arg3[%c0_4, %c0_5, %c0_6] : memref<1x5x256xf32, #tpu.memory_space<vmem>>, vector<1x5x256xf32>
    %4 = arith.addf %2, %3 : vector<1x5x256xf32>
    %c0_7 = arith.constant 0 : index
    %c0_8 = arith.constant 0 : index
    %c0_9 = arith.constant 0 : index
    %5 = vector.load %arg4[%c0_7, %c0_8, %c0_9] : memref<1x5x256xf32, #tpu.memory_space<vmem>>, vector<1x5x256xf32>
    tpu.vector_store %arg4[%c0_7, %c0_8, %c0_9], %4 {strides = array<i32>} : memref<1x5x256xf32, #tpu.memory_space<vmem>>, vector<1x5x256xf32>,
    return
  }
  func.func @transform_0(%arg0: i32) -> (i32, i32, i32) {
    %c0_i32 = arith.constant 0 : i32
    %c0_i32_0 = arith.constant 0 : i32
    %c0_i32_1 = arith.constant 0 : i32
    return %arg0, %c0_i32, %c0_i32_0 : i32, i32, i32
  }
  func.func @transform_1(%arg0: i32) -> (i32, i32) {
    %c0_i32 = arith.constant 0 : i32
    %c0_i32_0 = arith.constant 0 : i32
    %c0_i32_1 = arith.constant 0 : i32
    return %c0_i32, %c0_i32_0 : i32, i32
  }
  func.func @transform_2(%arg0: i32) -> (i32, i32, i32) {
    %c0_i32 = arith.constant 0 : i32
    %c0_i32_0 = arith.constant 0 : i32
    %c0_i32_1 = arith.constant 0 : i32
    %c0_i32_2 = arith.constant 0 : i32
    return %c0_i32, %c0_i32_0, %c0_i32_1 : i32, i32, i32
  }
  func.func @transform_3(%arg0: i32) -> (i32, i32, i32) {
    %c0_i32 = arith.constant 0 : i32
    %c0_i32_0 = arith.constant 0 : i32
    %c0_i32_1 = arith.constant 0 : i32
    return %arg0, %c0_i32, %c0_i32_0 : i32, i32, i32
  }
}

</mosaic_0001>

<bundles_post_ra>
// kernel: tpu_custom_call.1
= control target key start
LH: loop header
LB: loop body
LE: loop exit
PB: predicated region body
PF: predicated region fallthrough
CT: control target
= control target key end

     0   :  { %8 = vsyncpa [#allocation3], 0  ;;  %s681_s12 = smov 0   ;;  %s747_s0 = inlined_call_operand.vmem [shape: bf16[2,5,256], index: 0, kind: input, shape index: {}]   ;;  %s748_s1 = inlined_call_operand.hbm [shape: bf16[256,256], index: 1, kind: input, shape index: {}]   ;;  %s749_s2 = inlined_call_operand.vmem [shape: f32[1,5,256], index: 2, kind: input, shape index: {}]   ;;  %s750_s3 = inlined_call_operand.vmem [shape: f32[2,5,256], index: 3, kind: output, shape index: {}]  }
   0x1 LB: > { %s687_s13 = sadd.s32 4294967295, %s656_s12   ;;  %p500_p0 = scmp.ge.s32.totalorder %s656_s12, 1  ;;  %s656_s12 = sphi %s681_s12, %s14_s12  }
   0x2   : > { %p113_p1 = scmp.lt.s32.totalorder %s656_s12, 3  ;;  %s658_s14 = smov [#allocation2]  }
   0x3   : > { %s125_s15 = sshll.u32 %s658_s14, 4  ;;  %p751_p3 = scmp.eq.s32.totalorder %s687_s13, 0  ;;  %s126_s15 = int_to_ptr.vmem [resolvable:$true] %s125_s15 }
   0x4   : > { %p691_p2 = pnand %p500_p0, %p113_p1  ;;  %s618_s20 = scalar_lea.hbm %s748_s1, 4096 }
   0x5   : > { %p619_p6 = scmp.ne.s32.totalorder %s748_s1, %s618_s20  ;;  %p625_p10 = scmp.lt.u32.totalorder %s618_s20, %s748_s1 }
   0x6   : > { %s753_s16 = scalar_select %p691_p2, 1, 0 }
   0x7   : > { %p551_p4 = pneg %p691_p2 }
   0x9   : > { %p700_p5 = pnand %p751_p3, %p551_p4 }
   0xb   : > { %p620_p7 = pneg %p700_p5 }
   0xd   : > { %p621_p8 = pnand %p620_p7, %p619_p6 }
   0xf   : > { %p622_p9 = pneg %p621_p8 }
  0x11   : > { %p627_p11 = pnand %p625_p10, %p622_p9 }
  0x13   : > { %630 = shalt.err (!%p627_p11)
}
  0x14   : > { %s631_s25 = scalar_lea.vmem %s126_s15, 4096  ;;  %p639_p1 = scmp.lt.s32.totalorder %s126_s15, %s126_s15 }
  0x15   : > { %p632_p12 = scmp.ne.s32.totalorder %s126_s15, %s631_s25  ;;  %p640_p4 = scmp.lt.s32.totalorder %s631_s25, %s631_s25 }
  0x17   : > { %p634_p13 = pnand %p632_p12, %p620_p7  ;;  %p641_p3 = por %p640_p4, %p639_p1 }
  0x19   : > { %p635_p0 = pneg %p634_p13 }
  0x1b   : > { %p642_p2 = pnand %p641_p3, %p635_p0 }
  0x1d   : > { %645 = shalt.err (!%p642_p2)
}
  0x1e   : > { %s659_s26 = smov 128   ;;  %s660_s27 = smov 8  }
  0x1f   : > { %554 = dma.hbm_to_vmem [thread:$0]  (!%p700_p5), %s748_s1, 4096, %s126_s15, [#allocation3], %s659_s26, %s659_s26, %s660_s27  }
  0x20   : > { %p755_p6 = scmp.ne.s32.totalorder %s753_s16, 0 }
  0x21   : > { %p756_p8 = scmp.eq.s32.totalorder (!%p755_p6), %s687_s13, 0 }
  0x22   : > { %152 = sbr.rel (%p755_p6) target bundleno = 323 (0x143), region = 32 }
  0x29   : > { %651 = dma.done.wait (%p756_p8), [#allocation3], 4096   ;;  %p757_p7 = pmov %p756_p8 }
  0x2a   : > { %v568_v0 = vld [vmem:[#allocation2 + $0x4] ss:$8 sps:$4 sm:$0xff]   ;;  %v570_v1 = vld [vmem:[#allocation2] ss:$8 sps:$4 sm:$0xff]   ;;  %v571_v2 = vld [vmem:[#allocation2 + $0x14] ss:$8 sps:$4 sm:$0xff]  }
  0x2b   : > { %653 = vsyncadd (%p757_p7), [#allocation3], 4294963200  ;;  %388 = vmatprep.subr.bf16.mxu0 %v568_v0  ;;  %v573_v3 = vld [vmem:[#allocation2 + $0x10] ss:$8 sps:$4 sm:$0xff]   ;;  %v574_v4 = vld [vmem:[#allocation2 + $0x24] ss:$8 sps:$4 sm:$0xff]  }
  0x2c   : > { %389 = vmatpush1.bf16.msra.mxu0 %v570_v1  ;;  %v576_v5 = vld [vmem:[#allocation2 + $0x20] ss:$8 sps:$4 sm:$0xff]   ;;  %p176_p2 = scmp.lt.s32.totalorder %s687_s13, 1  ;;  %v577_v6 = vld [vmem:[#allocation2 + $0x34] ss:$8 sps:$4 sm:$0xff]  }
  0x2d   : > { %390 = vmatprep.subr.bf16.mxu0 %v571_v2  ;;  %v579_v7 = vld [vmem:[#allocation2 + $0x30] ss:$8 sps:$4 sm:$0xff]   ;;  %v580_v8 = vld [vmem:[#allocation2 + $0x44] ss:$8 sps:$4 sm:$0xff]   ;;  %v582_v9 = vld [vmem:[#allocation2 + $0x40] ss:$8 sps:$4 sm:$0xff]  }
  0x2e   : > { %s759_s13 = smov (!%p176_p2, %s687_s13), 1  ;;  %v583_v10 = vld [vmem:[#allocation2 + $0x54] ss:$8 sps:$4 sm:$0xff]   ;;  %v585_v11 = vld [vmem:[#allocation2 + $0x50] ss:$8 sps:$4 sm:$0xff]  }
  0x2f   : > { %s545_s30 = sshll.u32 %s759_s13, 3  ;;  %v586_v12 = vld [vmem:[#allocation2 + $0x64] ss:$8 sps:$4 sm:$0xff]   ;;  %v588_v15 = vld [vmem:[#allocation2 + $0x60] ss:$8 sps:$4 sm:$0xff]   ;;  %s546_s7 = sshll.u32 %s759_s13, 4 }
  0x30   : > { %391 = vmatpush1.bf16.msra.mxu0 %v573_v3  ;;  %s180_s6 = scalar_lea.vmem %s747_s0, %s545_s30  ;;  %v589_v16 = vld [vmem:[#allocation2 + $0x74] ss:$8 sps:$4 sm:$0xff]   ;;  %v591_v17 = vld [vmem:[#allocation2 + $0x70] ss:$8 sps:$4 sm:$0xff]   ;;  %v592_v18 = vld [vmem:[#allocation2 + $0x84] ss:$8 sps:$4 sm:$0xff]   ;;  %s185_s16 = scalar_lea.vmem %s750_s3, %s546_s7 }
  0x31   : > { %392 = vmatprep.subr.bf16.mxu0 %v574_v4  ;;  %v186_v13 = vld [vmem:[%s180_s6] sm:$0x77]  ;;  %v595_v20 = vld [vmem:[#allocation2 + $0x94] ss:$8 sps:$4 sm:$0xff]   ;;  %v597_v21 = vld [vmem:[#allocation2 + $0x90] ss:$8 sps:$4 sm:$0xff]  }
  0x32   : > { %v510_v14 = vcombine.high %v186_v13, %v186_v13  ;;  %v594_v19 = vld [vmem:[#allocation2 + $0x80] ss:$8 sps:$4 sm:$0xff]   ;;  %v598_v22 = vld [vmem:[#allocation2 + $0xa4] ss:$8 sps:$4 sm:$0xff]   ;;  %v601_v24 = vld [vmem:[#allocation2 + $0xb4] ss:$8 sps:$4 sm:$0xff]   ;;  %v509_v34 = vcombine.low %v186_v13, %v186_v13 }
  0x33   : > { %v600_v23 = vld [vmem:[#allocation2 + $0xa0] ss:$8 sps:$4 sm:$0xff]   ;;  %v603_v25 = vld [vmem:[#allocation2 + $0xb0] ss:$8 sps:$4 sm:$0xff]   ;;  %v604_v26 = vld [vmem:[#allocation2 + $0xc4] ss:$8 sps:$4 sm:$0xff]  }
  0x34   : > { %393 = vmatpush1.bf16.msra.mxu0 %v576_v5  ;;  %420 = vmatprep.mubr.bf16.mxu0 %v510_v14  ;;  %v606_v27 = vld [vmem:[#allocation2 + $0xc0] ss:$8 sps:$4 sm:$0xff]   ;;  %v607_v28 = vld [vmem:[#allocation2 + $0xd4] ss:$8 sps:$4 sm:$0xff]   ;;  %v609_v29 = vld [vmem:[#allocation2 + $0xd0] ss:$8 sps:$4 sm:$0xff]  }
  0x35   : > { %394 = vmatprep.subr.bf16.mxu0 %v577_v6  ;;  %v610_v30 = vld [vmem:[#allocation2 + $0xe4] ss:$8 sps:$4 sm:$0xff]   ;;  %v612_v31 = vld [vmem:[#allocation2 + $0xe0] ss:$8 sps:$4 sm:$0xff]   ;;  %v613_v32 = vld [vmem:[#allocation2 + $0xf4] ss:$8 sps:$4 sm:$0xff]  }
  0x36   : > { %v615_v33 = vld [vmem:[#allocation2 + $0xf0] ss:$8 sps:$4 sm:$0xff]   ;;  %v219_v35 = vld [vmem:[%s749_s2] sm:$0x1f]  ;;  %v220_v36 = vld [vmem:[%s749_s2 + $0x8] sm:$0x1f] }
  0x38   : > { %395 = vmatpush1.bf16.msra.mxu0 %v579_v7 }
  0x39   : > { %396 = vmatprep.subr.bf16.mxu0 %v580_v8 }
  0x3c   : > { %397 = vmatpush1.bf16.msra.mxu0 %v582_v9 }
  0x3d   : > { %398 = vmatprep.subr.bf16.mxu0 %v583_v10 }
  0x40   : > { %399 = vmatpush1.bf16.msra.mxu0 %v585_v11 }
  0x41   : > { %400 = vmatprep.subr.bf16.mxu0 %v586_v12 }
  0x44   : > { %401 = vmatpush1.bf16.msra.mxu0 %v588_v15 }
  0x45   : > { %402 = vmatprep.subr.bf16.mxu0 %v589_v16 }
  0x48   : > { %403 = vmatpush1.bf16.msra.mxu0 %v591_v17 }
  0x49   : > { %404 = vmatprep.subr.bf16.mxu0 %v592_v18 }
  0x4c   : > { %405 = vmatpush1.bf16.msra.mxu0 %v594_v19 }
  0x4d   : > { %406 = vmatprep.subr.bf16.mxu0 %v595_v20 }
  0x50   : > { %407 = vmatpush1.bf16.msra.mxu0 %v597_v21 }
  0x51   : > { %408 = vmatprep.subr.bf16.mxu0 %v598_v22 }
  0x54   : > { %409 = vmatpush1.bf16.msra.mxu0 %v600_v23 }
  0x55   : > { %410 = vmatprep.subr.bf16.mxu0 %v601_v24 }
  0x58   : > { %411 = vmatpush1.bf16.msra.mxu0 %v603_v25 }
  0x59   : > { %412 = vmatprep.subr.bf16.mxu0 %v604_v26 }
  0x5c   : > { %413 = vmatpush1.bf16.msra.mxu0 %v606_v27 }
  0x5d   : > { %414 = vmatprep.subr.bf16.mxu0 %v607_v28 }
  0x60   : > { %415 = vmatpush1.bf16.msra.mxu0 %v609_v29 }
  0x61   : > { %416 = vmatprep.subr.bf16.mxu0 %v610_v30 }
  0x64   : > { %417 = vmatpush1.bf16.msra.mxu0 %v612_v31 }
  0x65   : > { %418 = vmatprep.subr.bf16.mxu0 %v613_v32 }
  0x68   : > { %419 = vmatpush1.bf16.msra.mxu0 %v615_v33 }
  0x6b   : > { %421 = vmatmul.mubr.bf16.vlgmr.msra.gmra.mrb[0].mxu0 %v509_v34 }
 0x13e   : > { %v422_v37 = vpop.f32.mrb[0].mxu0 }
 0x13f   : > { %v423_v38 = vadd.f32 %v422_v37, %v219_v35  ;;  %v424_v39 = vpop.f32.mrb[1].mxu0 }
 0x140   : > { %v425_v40 = vadd.f32 %v424_v39, %v220_v36  ;;  %v426_v41 = vpop.f32.mrb[2].mxu0 }
 0x141   : > { %429 = vst [vmem:[%s185_s16] sm:$0x1f] %v423_v38  ;;  %v427_v42 = vpop.f32.mrb[3].mxu0 }
 0x142   : > { %430 = vst [vmem:[%s185_s16 + $0x8] sm:$0x1f] %v425_v40 }
 0x143 PF: > { %s14_s12 = sadd.s32 1, %s656_s12  }
 0x144   : > { %p11_p3 = scmp.ge.s32.totalorder %s14_s12, 4  }
 0x146   :  { %13 = sbr.rel (!%p11_p3) target bundleno = 1 (0x1), region = 67 }
 0x14d   :  { %452 = vsyncpa [#allocation3], 1 }
 0x14e   :  { %454 = vsyncpa [#allocation3 + $0x1], 1 }

</bundles_post_ra>
